<compile_context>
chip_gen: v6e
topology: v6e:2x2x1
jax: 0.10.0
libtpu: 0.0.40
codegen_flags: <defaults>
</compile_context>

<pallas_src>
import jax
import jax.numpy as jnp
from jax import lax
from jax.experimental import pallas as pl
from jax.experimental.pallas import tpu as pltpu


_VMEM = pl.BlockSpec(memory_space=pltpu.MemorySpace.VMEM)


def _pick_seq_tile(S, row_bytes, budget_bytes=2 << 20):
    """Largest tile TS that divides S, is a multiple of 8 (or TS == S), and whose
    encoder tile fits the per-buffer VMEM budget (double-buffered by Pallas)."""
    if S * row_bytes <= budget_bytes:
        return S
    best = None
    ts = 8
    while ts <= S:
        if S % ts == 0 and ts * row_bytes <= budget_bytes:
            best = ts
        ts += 8
    return best if best is not None else S


# ---------------------------------------------------------------------------
# Kernels
# ---------------------------------------------------------------------------

def _general_prep_kernel(h_ref, w_ref, b_ref, q_ref, c_ref):
    # hidden: (B, H), W: (H, H) torch (out, in) layout, b: (1, H)
    # q = hidden @ W        (exact rewrite: sum_o hidden[b,o] W[o,k])
    # c[0, b] = hidden[b, :] . bias
    h = h_ref[...]
    q_ref[...] = lax.dot_general(h, w_ref[...], (((1,), (0,)), ((), ())),
                                 preferred_element_type=jnp.float32)
    c_ref[...] = lax.dot_general(b_ref[...], h, (((1,), (1,)), ((), ())),
                                 preferred_element_type=jnp.float32)


def _score_kernel(q_ref, c_ref, enc_ref, out_ref):
    # q: (B, H), c: (1, B), enc tile: (TS, B, H), out tile: (TS, B)
    # scores[s, b] = enc[s, b, :] . q[b, :] + c[b]
    e = enc_ref[...]
    scores = jnp.sum(q_ref[...][None, :, :] * e, axis=2)      # (TS, B)
    out_ref[...] = scores + c_ref[...]


def _concat_prep_kernel(h_ref, wh_ref, b_ref, hproj_ref):
    # hproj = hidden @ W_h^T + bias : (B, H), computed once per call
    hproj_ref[...] = lax.dot_general(h_ref[...], wh_ref[...],
                                     (((1,), (1,)), ((), ())),
                                     preferred_element_type=jnp.float32) + b_ref[...]


def _concat_score_kernel(hrow_ref, we_ref, v_ref, enc_ref, out_ref):
    # hrow: (TR, H) = hproj repeated per flattened (seq*batch) row,
    # W_e: (H, H) (out, in), v: (1, H), enc tile: (TR, H) flat, out: (TR, 1)
    eproj = lax.dot_general(enc_ref[...], we_ref[...],
                            (((1,), (1,)), ((), ())),
                            preferred_element_type=jnp.float32)   # (TR, H)
    energy = jnp.tanh(eproj + hrow_ref[...])                      # (TR, H)
    out_ref[...] = jnp.sum(energy * v_ref[...], axis=1, keepdims=True)


# ---------------------------------------------------------------------------
# Wrapper
# ---------------------------------------------------------------------------

def attention_layer(method, hidden, encoder_outputs, params, seq_tile=None):
    """Forward pass of AttentionLayer.

    hidden: (1, B, H) f32, encoder_outputs: (S, B, H) f32. Returns (B, 1, S) f32.
    """
    if method not in ("dot", "general", "concat"):
        raise ValueError(method)
    S, B, H = encoder_outputs.shape
    h2 = hidden.reshape(B, H)                         # squeeze leading 1 (glue)

    ts = seq_tile if seq_tile is not None else _pick_seq_tile(S, B * H * 4)
    assert S % ts == 0 and (ts == S or ts % 8 == 0), (S, ts)
    grid = (S // ts,)
    cparams = pltpu.CompilerParams(
        dimension_semantics=("parallel",),            # megacore-shardable S axis
        vmem_limit_bytes=32 * 1024 * 1024)

    if method in ("dot", "general"):
        if method == "dot":
            q = h2
            c = jnp.zeros((1, B), jnp.float32)
        else:
            w = params["attn_w"]
            b = params["attn_b"].reshape(1, H)
            q, c = pl.pallas_call(
                _general_prep_kernel,
                out_shape=(jax.ShapeDtypeStruct((B, H), jnp.float32),
                           jax.ShapeDtypeStruct((1, B), jnp.float32)),
                in_specs=[_VMEM, _VMEM, _VMEM],
                out_specs=(_VMEM, _VMEM),
            )(h2, w, b)

        cost = pl.CostEstimate(
            flops=2 * S * B * H, transcendentals=0,
            bytes_accessed=4 * (S * B * H + S * B + B * H + B))
        scores_sb = pl.pallas_call(
            _score_kernel,
            out_shape=jax.ShapeDtypeStruct((S, B), jnp.float32),
            grid=grid,
            in_specs=[pl.BlockSpec((B, H), lambda i: (0, 0)),
                      pl.BlockSpec((1, B), lambda i: (0, 0)),
                      pl.BlockSpec((ts, B, H), lambda i: (i, 0, 0))],
            out_specs=pl.BlockSpec((ts, B), lambda i: (i, 0)),
            compiler_params=cparams,
            cost_estimate=cost,
        )(q, c, encoder_outputs)
        return scores_sb.T[:, None, :]                # (B, 1, S)

    # ---- concat ----
    w = params["attn_w"]                              # (H, 2H) torch layout
    b = params["attn_b"].reshape(1, H)
    v = params["v"].reshape(1, H)
    w_h, w_e = w[:, :H], w[:, H:]                     # split along input dim

    hproj = pl.pallas_call(
        _concat_prep_kernel,
        out_shape=jax.ShapeDtypeStruct((B, H), jnp.float32),
        in_specs=[_VMEM, _VMEM, _VMEM],
        out_specs=_VMEM,
    )(h2, w_h, b)

    tr = ts * B
    hrow = jnp.tile(hproj, (ts, 1))                   # (TR, H), identical per tile
    enc_flat = encoder_outputs.reshape(S * B, H)      # free row-major view

    cost = pl.CostEstimate(
        flops=2 * S * B * H * H + 4 * S * B * H,
        transcendentals=S * B * H,
        bytes_accessed=4 * (S * B * H + S * B + H * H + tr * H + H))
    scores_flat = pl.pallas_call(
        _concat_score_kernel,
        out_shape=jax.ShapeDtypeStruct((S * B, 1), jnp.float32),
        grid=grid,
        in_specs=[pl.BlockSpec((tr, H), lambda i: (0, 0)),
                  pl.BlockSpec((H, H), lambda i: (0, 0)),
                  pl.BlockSpec((1, H), lambda i: (0, 0)),
                  pl.BlockSpec((tr, H), lambda i: (i, 0))],
        out_specs=pl.BlockSpec((tr, 1), lambda i: (i, 0)),
        compiler_params=cparams,
        cost_estimate=cost,
    )(hrow, w_e, v, enc_flat)
    return scores_flat.reshape(S, B).T[:, None, :]    # (B, 1, S)


# ---------------------------------------------------------------------------
# Pure-JAX reference (mirrors the PyTorch module semantics)
# ---------------------------------------------------------------------------

def attention_layer_ref(method, hidden, encoder_outputs, params):
    if method == "dot":
        energies = jnp.sum(hidden * encoder_outputs, axis=2)       # (S, B)
    elif method == "general":
        w, b = params["attn_w"], params["attn_b"]
        energy = encoder_outputs @ w.T + b                         # (S, B, H)
        energies = jnp.sum(hidden * energy, axis=2)
    else:  # concat
        w, b, v = params["attn_w"], params["attn_b"], params["v"]
        S = encoder_outputs.shape[0]
        h_exp = jnp.broadcast_to(hidden, (S,) + hidden.shape[1:])
        cat = jnp.concatenate([h_exp, encoder_outputs], axis=2)
        energy = jnp.tanh(cat @ w.T + b)
        energies = jnp.sum(v * energy, axis=2)
    return energies.T[:, None, :]


# ---------------------------------------------------------------------------
# Main
# ---------------------------------------------------------------------------

if __name__ == "__main__":
    def make_inputs(B, S, H):
        key = jax.random.PRNGKey(0)
        k_h, k_e, k_w1, k_b1, k_w2, k_b2, k_v = jax.random.split(key, 7)
        hidden = jax.random.normal(k_h, (1, B, H), dtype=jnp.float32)
        enc = jax.random.normal(k_e, (S, B, H), dtype=jnp.float32)
        params_general = {
            "attn_w": jax.random.normal(k_w1, (H, H), dtype=jnp.float32) * 0.1,
            "attn_b": jax.random.normal(k_b1, (H,), dtype=jnp.float32) * 0.1,
        }
        params_concat = {
            "attn_w": jax.random.normal(k_w2, (H, 2 * H), dtype=jnp.float32) * 0.1,
            "attn_b": jax.random.normal(k_b2, (H,), dtype=jnp.float32) * 0.1,
            "v": jax.random.normal(k_v, (H,), dtype=jnp.float32) * 0.1,
        }
        return hidden, enc, params_general, params_concat

    ok = True
    # Primary small case from the module (B=2, S=8, H=32) runs as a single
    # block; the second case forces a multi-step S grid to exercise the
    # pipelined path.
    for (B, S, H, seq_tile) in [(2, 8, 32, None), (2, 256, 128, 64)]:
        hidden, enc, pg, pc = make_inputs(B, S, H)
        for method, params in [("dot", {}), ("general", pg), ("concat", pc)]:
            out = attention_layer(method, hidden, enc, params, seq_tile=seq_tile)
            jax.block_until_ready(out)
            ref = attention_layer_ref(method, hidden, enc, params)
            if out.shape != (B, 1, S) or not jnp.allclose(out, ref,
                                                          atol=1e-5, rtol=1e-5):
                ok = False
                err = float(jnp.max(jnp.abs(out - ref)))
                print(f"mismatch method={method} B={B} S={S} H={H} max_err={err}")

    if ok:
        print("KERNEL_OK")
</pallas_src>

<mosaic_0001>
module attributes {stable_mosaic.version = 11 : i64} {
  func.func @_score_kernel(%arg0: i32, %arg1: memref<2x32xf32, #tpu.memory_space<vmem>>, %arg2: memref<1x2xf32, #tpu.memory_space<vmem>>, %arg3: memref<8x2x32xf32, #tpu.memory_space<vmem>>, %arg4: memref<8x2xf32, #tpu.memory_space<vmem>>) attributes {dimension_semantics = [#tpu.dimension_semantics<parallel>], iteration_bounds = array<i64: 1>, scalar_prefetch = 0 : i64, scratch_operands = 0 : i64, tpu.core_type = #tpu.core_type<tc>, window_params = [{pipeline_mode = #tpu.pipeline_mode<synchronous>, transform_indices = @transform_0, window_bounds = array<i64: 2, 32>}, {pipeline_mode = #tpu.pipeline_mode<synchronous>, transform_indices = @transform_1, window_bounds = array<i64: 1, 2>}, {transform_indices = @transform_2, window_bounds = array<i64: 8, 2, 32>}, {transform_indices = @transform_3, window_bounds = array<i64: 8, 2>}]} {
    %c0 = arith.constant 0 : index
    %c0_0 = arith.constant 0 : index
    %c0_1 = arith.constant 0 : index
    %0 = vector.load %arg3[%c0, %c0_0, %c0_1] : memref<8x2x32xf32, #tpu.memory_space<vmem>>, vector<8x2x32xf32>
    %c0_2 = arith.constant 0 : index
    %c0_3 = arith.constant 0 : index
    %1 = vector.load %arg1[%c0_2, %c0_3] : memref<2x32xf32, #tpu.memory_space<vmem>>, vector<2x32xf32>
    %2 = vector.shape_cast %1 : vector<2x32xf32> to vector<1x2x32xf32>
    %3 = vector.broadcast %2 : vector<1x2x32xf32> to vector<8x2x32xf32>
    %4 = arith.mulf %3, %0 : vector<8x2x32xf32>
    %cst = arith.constant dense<0.000000e+00> : vector<8x2xf32>
    %5 = vector.multi_reduction <add>, %4, %cst [2] : vector<8x2x32xf32> to vector<8x2xf32>
    %c0_4 = arith.constant 0 : index
    %c0_5 = arith.constant 0 : index
    %6 = vector.load %arg2[%c0_4, %c0_5] : memref<1x2xf32, #tpu.memory_space<vmem>>, vector<1x2xf32>
    %7 = vector.broadcast %6 : vector<1x2xf32> to vector<8x2xf32>
    %8 = arith.addf %5, %7 : vector<8x2xf32>
    %c0_6 = arith.constant 0 : index
    %c0_7 = arith.constant 0 : index
    %9 = vector.load %arg4[%c0_6, %c0_7] : memref<8x2xf32, #tpu.memory_space<vmem>>, vector<8x2xf32>
    tpu.vector_store %arg4[%c0_6, %c0_7], %8 {strides = array<i32>} : memref<8x2xf32, #tpu.memory_space<vmem>>, vector<8x2xf32>,
    return
  }
  func.func @transform_0(%arg0: i32) -> (i32, i32) {
    %c0_i32 = arith.constant 0 : i32
    %c0_i32_0 = arith.constant 0 : i32
    %c0_i32_1 = arith.constant 0 : i32
    return %c0_i32, %c0_i32_0 : i32, i32
  }
  func.func @transform_1(%arg0: i32) -> (i32, i32) {
    %c0_i32 = arith.constant 0 : i32
    %c0_i32_0 = arith.constant 0 : i32
    %c0_i32_1 = arith.constant 0 : i32
    return %c0_i32, %c0_i32_0 : i32, i32
  }
  func.func @transform_2(%arg0: i32) -> (i32, i32, i32) {
    %c0_i32 = arith.constant 0 : i32
    %c0_i32_0 = arith.constant 0 : i32
    %c0_i32_1 = arith.constant 0 : i32
    return %arg0, %c0_i32, %c0_i32_0 : i32, i32, i32
  }
  func.func @transform_3(%arg0: i32) -> (i32, i32) {
    %c0_i32 = arith.constant 0 : i32
    %c0_i32_0 = arith.constant 0 : i32
    return %arg0, %c0_i32 : i32, i32
  }
}

</mosaic_0001>

<bundles_post_ra>
// kernel: tpu_custom_call.1
= control target key start
LH: loop header
LB: loop body
LE: loop exit
PB: predicated region body
PF: predicated region fallthrough
CT: control target
= control target key end

     0   :  { %8 = vsyncpa [#allocation3], 0  ;;  %s286_s0 = inlined_call_operand.hbm [shape: f32[2,32], index: 0, kind: input, shape index: {}]   ;;  %s287_s1 = inlined_call_operand.vmem [shape: f32[1,2], index: 1, kind: input, shape index: {}]   ;;  %s288_s2 = inlined_call_operand.hbm [shape: f32[8,2,32], index: 2, kind: input, shape index: {}]   ;;  %s289_s3 = inlined_call_operand.vmem [shape: f32[8,2], index: 3, kind: output, shape index: {}]  }
   0x1   :  { %9 = vsyncpa [#allocation5], 0  ;;  %s241_s12 = smov [#allocation2]   ;;  %s242_s14 = smov [#allocation4]  }
   0x2   :  { %s16_s13 = sshll.u32 %s241_s12, 4  ;;  %s27_s15 = sshll.u32 %s242_s14, 4  ;;  %s17_s13 = int_to_ptr.vmem [resolvable:$true] %s16_s13  ;;  %s28_s15 = int_to_ptr.vmem [resolvable:$true] %s27_s15 }
   0x3   :  { %s205_s16 = scalar_lea.vmem %s17_s13, 32  ;;  %p210_p1 = scmp.lt.s32.totalorder %s17_s13, %s17_s13 }
   0x4   :  { %p206_p0 = scmp.ne.s32.totalorder %s17_s13, %s205_s16  ;;  %p211_p2 = scmp.lt.s32.totalorder %s205_s16, %s205_s16 }
   0x6   :  { %p212_p3 = por %p211_p2, %p210_p1 }
   0x8   :  { %p213_p4 = pnand %p212_p3, %p206_p0 }
   0xa   :  { %216 = shalt.err (!%p213_p4)
}
   0xb   :  { %19 = dma.hbm_to_vmem [thread:$0]  %s286_s0, 32, %s17_s13, [#allocation3]  }
   0xc   :  { %s225_s19 = scalar_lea.vmem %s28_s15, 256  ;;  %p230_p6 = scmp.lt.s32.totalorder %s28_s15, %s28_s15 }
   0xd   :  { %p226_p5 = scmp.ne.s32.totalorder %s28_s15, %s225_s19  ;;  %p231_p7 = scmp.lt.s32.totalorder %s225_s19, %s225_s19 }
   0xf   :  { %p232_p8 = por %p231_p7, %p230_p6 }
  0x11   :  { %p233_p9 = pnand %p232_p8, %p226_p5 }
  0x13   :  { %236 = shalt.err (!%p233_p9)
}
  0x14   :  { %s243_s20 = smov 32   ;;  %s244_s21 = smov 2  }
  0x15   :  { %33 = dma.hbm_to_vmem [thread:$0]  %s288_s2, 256, %s28_s15, [#allocation5], %s243_s20, %s243_s20, %s244_s21  }
  0x16   :  { %237 = dma.done.wait [#allocation3], 32  }
  0x17   :  { %238 = vsyncadd [#allocation3], 4294967264 }
  0x18   :  { %239 = dma.done.wait [#allocation5], 256  }
  0x19   :  { %240 = vsyncadd [#allocation5], 4294967040  ;;  %vm57_vm0 = vcmask 254976   ;;  %v40_v0 = vld [vmem:[#allocation4] sm:$0x3]  ;;  %v245_v25 = vmov 0   ;;  %v132_v44 = vlaneseq }
  0x1a   :  { %v48_v1 = vld [vmem:[#allocation2] sm:$0x3]  ;;  %v42_v2 = vld [vmem:[#allocation4 + $0x4] sm:$0x3]  ;;  %v41_v5 = vld [vmem:[#allocation4 + $0x2] sm:$0x3]  ;;  %196 = vset.pattern.permute.xlu0 %v245_v25  ;;  %195 = vset.pattern.permute.xlu1 %v245_v25 }
  0x1b   :  { %v49_v3 = vmul.f32 %v48_v1, %v40_v0  ;;  %v51_v4 = vmul.f32 %v48_v1, %v42_v2  ;;  %v43_v6 = vld [vmem:[#allocation4 + $0x6] sm:$0x3]  ;;  %v50_v7 = vmul.f32 %v48_v1, %v41_v5  ;;  %v44_v9 = vld [vmem:[#allocation4 + $0x8] sm:$0x3]  ;;  %v45_v10 = vld [vmem:[#allocation4 + $0xa] sm:$0x3] }
  0x1c   :  { %v52_v8 = vmul.f32 %v48_v1, %v43_v6  ;;  %v53_v15 = vmul.f32 %v48_v1, %v44_v9  ;;  %v54_v16 = vmul.f32 %v48_v1, %v45_v10  ;;  %v46_v17 = vld [vmem:[#allocation4 + $0xc] sm:$0x3]  ;;  %v47_v18 = vld [vmem:[#allocation4 + $0xe] sm:$0x3]  ;;  %v189_v26 = vld [vmem:[%s287_s1] ss:$0 sm:$0xff] }
  0x1d   :  { %v58_v11 = vsel %vm57_vm0, %v49_v3, 0.0  ;;  %v64_v12 = vsel %vm57_vm0, %v51_v4, 0.0  ;;  %v61_v13 = vsel %vm57_vm0, %v50_v7, 0.0  ;;  %v55_v21 = vmul.f32 %v48_v1, %v46_v17 }
  0x1e   :  { %59 = vadd.xlane.f32.xlu0 %v58_v11  ;;  %65 = vadd.xlane.f32.xlu1 %v64_v12  ;;  %v67_v14 = vsel %vm57_vm0, %v52_v8, 0.0  ;;  %v70_v19 = vsel %vm57_vm0, %v53_v15, 0.0  ;;  %v73_v20 = vsel %vm57_vm0, %v54_v16, 0.0  ;;  %v56_v22 = vmul.f32 %v48_v1, %v47_v18 }
  0x1f   :  { %v76_v23 = vsel %vm57_vm0, %v55_v21, 0.0  ;;  %v133_v46 = vand.u32 127, %v132_v44  ;;  %v135_v47 = vshrl.u32 %v132_v44, 7  ;;  %vm166_vm1 = vcmask 1041409  }
  0x20   :  { %v79_v24 = vsel %vm57_vm0, %v56_v22, 0.0  ;;  %vm168_vm2 = vcmask 1042434   ;;  %vm170_vm3 = vcmask 1043459   ;;  %vm172_vm4 = vcmask 1044484  }
  0x21   :  { %v136_v49 = vsub.s32 %v133_v46, %v135_v47  ;;  %vm174_vm5 = vcmask 1045509   ;;  %vm176_vm6 = vcmask 1046534   ;;  %vm178_vm7 = vcmask 1047559  }
  0x22   :  { %62 = vadd.xlane.f32.xlu0 %v61_v13  ;;  %68 = vadd.xlane.f32.xlu1 %v67_v14  ;;  %vm181_vm8 = vcmask 15360  }
  0x26   :  { %71 = vadd.xlane.f32.xlu0 %v70_v19  ;;  %74 = vadd.xlane.f32.xlu1 %v73_v20 }
  0x2a   :  { %77 = vadd.xlane.f32.xlu0 %v76_v23  ;;  %80 = vadd.xlane.f32.xlu1 %v79_v24 }
  0x40   :  { %89 = vbcast.lane.b32.xlu0 %v189_v26, 256 }
  0xa7   :  { %v60_v27 = vpop.xlane.xlu0 %59  ;;  %v66_v30 = vpop.xlane.xlu1 %65 }
  0xab   :  { %v63_v28 = vpop.xlane.xlu0 %62  ;;  %v69_v32 = vpop.xlane.xlu1 %68 }
  0xaf   :  { %v72_v29 = vpop.xlane.xlu0 %71  ;;  %v75_v39 = vpop.xlane.xlu1 %74 }
  0xb3   :  { %v78_v31 = vpop.xlane.xlu0 %77  ;;  %v81_v42 = vpop.xlane.xlu1 %80 }
  0xb7   :  { %v90_v33 = vpop.permute.xlu0 %89 }
  0xb8   :  { %v95_v34 = vadd.f32 %v90_v33, %v69_v32  ;;  %v92_v35 = vadd.f32 %v90_v33, %v60_v27  ;;  %v98_v36 = vadd.f32 %v90_v33, %v78_v31  ;;  %v93_v37 = vadd.f32 %v90_v33, %v63_v28 }
  0xb9   :  { %v94_v38 = vadd.f32 %v90_v33, %v66_v30  ;;  %v96_v40 = vadd.f32 %v90_v33, %v72_v29  ;;  %v97_v41 = vadd.f32 %v90_v33, %v75_v39  ;;  %v99_v43 = vadd.f32 %v90_v33, %v81_v42 }
  0xba   :  { %118 = vperm.xlu0 %196, %v95_v34   ;;  %109 = vperm.xlu1 %195, %v92_v35  }
  0xbe   :  { %127 = vperm.xlu0 %196, %v98_v36   ;;  %112 = vperm.xlu1 %195, %v93_v37  }
  0xc2   :  { %115 = vperm.xlu1 %195, %v94_v38  }
  0xc6   :  { %121 = vperm.xlu1 %195, %v96_v40  }
  0xca   :  { %124 = vperm.xlu1 %195, %v97_v41  }
  0xce   :  { %130 = vperm.xlu1 %195, %v99_v43  }
 0x135   :  { %v110_v45 = vpop.permute.xlu1 %109  ;;  %v119_v53 = vpop.permute.xlu0 %118 }
 0x136   :  { %v137_v54 = vrot.slane %v110_v45, %v136_v49  ;;  %v149_v59 = vrot.slane %v119_v53, %v136_v49 }
 0x139   :  { %v113_v48 = vpop.permute.xlu1 %112  ;;  %v128_v61 = vpop.permute.xlu0 %127 }
 0x13a   :  { %v141_v51 = vrot.slane %v113_v48, %v136_v49  ;;  %v161_v2 = vrot.slane %v128_v61, %v136_v49 }
 0x13c   :  { %v167_v56 = vsel %vm166_vm1, %v141_v51, %v137_v54 }
 0x13d   :  { %v116_v50 = vpop.permute.xlu1 %115 }
 0x13e   :  { %v145_v52 = vrot.slane %v116_v50, %v136_v49 }
 0x140   :  { %v169_v57 = vsel %vm168_vm2, %v145_v52, %v167_v56 }
 0x141   :  { %v122_v55 = vpop.permute.xlu1 %121  ;;  %v171_v62 = vsel %vm170_vm3, %v149_v59, %v169_v57 }
 0x142   :  { %v153_v58 = vrot.slane %v122_v55, %v136_v49 }
 0x144   :  { %v173_v0 = vsel %vm172_vm4, %v153_v58, %v171_v62 }
 0x145   :  { %v125_v60 = vpop.permute.xlu1 %124 }
 0x146   :  { %v157_v63 = vrot.slane %v125_v60, %v136_v49 }
 0x148   :  { %v175_v1 = vsel %vm174_vm5, %v157_v63, %v173_v0 }
 0x149   :  { %v131_v3 = vpop.permute.xlu1 %130  ;;  %v177_v5 = vsel %vm176_vm6, %v161_v2, %v175_v1 }
 0x14a   :  { %v165_v4 = vrot.slane %v131_v3, %v136_v49 }
 0x14c   :  { %v179_v6 = vsel %vm178_vm7, %v165_v4, %v177_v5 }
 0x14d   :  { %182 = vst.msk [vmem:[%s289_s3] sm:$0xff] %vm181_vm8, %v179_v6 }
 0x14e   :  { %187 = vsyncpa [#allocation3], 1 }
 0x14f   :  { %188 = vsyncpa [#allocation5], 1 }

</bundles_post_ra>
